<compile_context>
chip_gen: v7x
topology: tpu7x:2x2x1
jax: 0.10.0
libtpu: 0.0.40
codegen_flags: <defaults>
</compile_context>

<pallas_src>
import functools

import jax
import jax.numpy as jnp
from jax.experimental import pallas as pl
from jax.experimental.pallas import tpu as pltpu


def _round_up(x, m):
    return ((x + m - 1) // m) * m


def _mlp_kernel(z_ref, w1_ref, b1_ref, w2t_ref, b2_ref, o_ref):
    # z: (TB, D), w1: (D, H), b1: (1, H), w2t: (1, H), b2: (1, 1) in SMEM, out: (TB, 1)
    # MXU matmul with f32 accumulation.
    h = jnp.dot(z_ref[...], w1_ref[...], preferred_element_type=jnp.float32)
    h = jnp.maximum(h + b1_ref[...], 0.0)  # bias + ReLU on the VPU (f32)
    # Second Linear (H -> 1) as VPU multiply + XLU lane reduce instead of an N=1 matmul.
    out = jnp.sum(h * w2t_ref[...], axis=-1, keepdims=True) + b2_ref[0, 0]
    o_ref[...] = out.astype(o_ref.dtype)


@functools.partial(jax.jit, static_argnames=("block_b", "compute_dtype"))
def profiler_h_forward(z, w1, b1, w2, b2, *, block_b=256, compute_dtype=None):
    """Fused height_regressor forward.

    z: (B, D) -> (B, 1).  Weights stored as (in_features, out_features):
      w1: (D, H), b1: (H,), w2: (H, 1), b2: (1,)  with H = D // 4.

    compute_dtype: optionally jnp.bfloat16 to halve z/W1 HBM traffic on v6e/v7x
    (accumulation stays f32 inside the kernel).
    """
    B, D = z.shape
    H = w1.shape[1]

    # Optional narrow-precision inputs for the MXU matmul (accum stays f32).
    if compute_dtype is not None:
        z = z.astype(compute_dtype)
        w1 = w1.astype(compute_dtype)

    # Pick a batch tile: multiple of 8 (sublane), capped at block_b, and pad B to it.
    if B <= block_b:
        TB = _round_up(B, 8)
        Bp = TB
    else:
        TB = block_b
        Bp = _round_up(B, TB)
    if Bp != B:
        z = jnp.pad(z, ((0, Bp - B), (0, 0)))

    b1_2d = b1.reshape(1, H)          # lane-dense bias row
    w2t = w2.reshape(1, H)            # transposed second-layer weights (lane-dense)
    b2_2d = b2.reshape(1, 1)          # SMEM scalar

    grid = (Bp // TB,)

    out = pl.pallas_call(
        _mlp_kernel,
        out_shape=jax.ShapeDtypeStruct((Bp, 1), jnp.float32),
        grid_spec=pl.GridSpec(
            grid=grid,
            in_specs=[
                pl.BlockSpec((TB, D), lambda i: (i, 0)),   # z tile, pipelined over batch
                pl.BlockSpec((D, H), lambda i: (0, 0)),    # W1 resident
                pl.BlockSpec((1, H), lambda i: (0, 0)),    # b1 resident
                pl.BlockSpec((1, H), lambda i: (0, 0)),    # w2^T resident
                pl.BlockSpec(memory_space=pltpu.MemorySpace.SMEM),  # b2 scalar
            ],
            out_specs=pl.BlockSpec((TB, 1), lambda i: (i, 0)),
        ),
        compiler_params=pltpu.CompilerParams(
            dimension_semantics=("parallel",),  # independent batch tiles (v7x 2-TC)
        ),
    )(z, w1, b1_2d, w2t, b2_2d)

    return out[:B]


def init_params(key, dim):
    """Deterministic parameter init mimicking nn.Linear shapes (dim -> dim//4 -> 1)."""
    hidden = dim // 4
    k1, k2, k3, k4 = jax.random.split(key, 4)
    lim1 = 1.0 / jnp.sqrt(dim)
    lim2 = 1.0 / jnp.sqrt(hidden)
    w1 = jax.random.uniform(k1, (dim, hidden), jnp.float32, -lim1, lim1)
    b1 = jax.random.uniform(k2, (hidden,), jnp.float32, -lim1, lim1)
    w2 = jax.random.uniform(k3, (hidden, 1), jnp.float32, -lim2, lim2)
    b2 = jax.random.uniform(k4, (1,), jnp.float32, -lim2, lim2)
    return w1, b1, w2, b2


def _reference(z, w1, b1, w2, b2):
    return jnp.maximum(z @ w1 + b1, 0.0) @ w2 + b2


if __name__ == "__main__":
    key = jax.random.PRNGKey(0)
    kz1, kz2, kp = jax.random.split(key, 3)

    D = 512  # module default (lstm_h = 512), hidden = 128
    w1, b1, w2, b2 = init_params(kp, D)

    # Case 1: small batch, single grid step.
    B1 = 8
    z1 = jax.random.normal(kz1, (B1, D), dtype=jnp.float32)
    h1 = jax.block_until_ready(profiler_h_forward(z1, w1, b1, w2, b2))
    ref1 = _reference(z1, w1, b1, w2, b2)
    assert h1.shape == (B1, 1)
    assert jnp.allclose(h1, ref1, atol=1e-4, rtol=1e-4)

    # Case 2: batch not a multiple of the tile -> exercises tiling + padding path.
    B2 = 272
    z2 = jax.random.normal(kz2, (B2, D), dtype=jnp.float32)
    h2 = jax.block_until_ready(profiler_h_forward(z2, w1, b1, w2, b2, block_b=128))
    ref2 = _reference(z2, w1, b1, w2, b2)
    assert h2.shape == (B2, 1)
    assert jnp.allclose(h2, ref2, atol=1e-4, rtol=1e-4)

    print("KERNEL_OK")
</pallas_src>

<mosaic_0001>
module attributes {stable_mosaic.version = 11 : i64} {
  func.func @_mlp_kernel(%arg0: i32, %arg1: memref<8x512xf32, #tpu.memory_space<vmem>>, %arg2: memref<512x128xf32, #tpu.memory_space<vmem>>, %arg3: memref<1x128xf32, #tpu.memory_space<vmem>>, %arg4: memref<1x128xf32, #tpu.memory_space<vmem>>, %arg5: memref<1x1xf32, #tpu.memory_space<smem>>, %arg6: memref<8x1xf32, #tpu.memory_space<vmem>>) attributes {dimension_semantics = [#tpu.dimension_semantics<parallel>], iteration_bounds = array<i64: 1>, scalar_prefetch = 0 : i64, scratch_operands = 0 : i64, tpu.core_type = #tpu.core_type<tc>, window_params = [{transform_indices = @transform_0, window_bounds = array<i64: 8, 512>}, {pipeline_mode = #tpu.pipeline_mode<synchronous>, transform_indices = @transform_1, window_bounds = array<i64: 512, 128>}, {pipeline_mode = #tpu.pipeline_mode<synchronous>, transform_indices = @transform_2, window_bounds = array<i64: 1, 128>}, {pipeline_mode = #tpu.pipeline_mode<synchronous>, transform_indices = @transform_3, window_bounds = array<i64: 1, 128>}, {transform_indices = @transform_4, window_bounds = array<i64: 1, 1>}, {transform_indices = @transform_5, window_bounds = array<i64: 8, 1>}]} {
    %c0 = arith.constant 0 : index
    %c0_0 = arith.constant 0 : index
    %0 = vector.load %arg1[%c0, %c0_0] : memref<8x512xf32, #tpu.memory_space<vmem>>, vector<8x512xf32>
    %c0_1 = arith.constant 0 : index
    %c0_2 = arith.constant 0 : index
    %1 = vector.load %arg2[%c0_1, %c0_2] : memref<512x128xf32, #tpu.memory_space<vmem>>, vector<512x128xf32>
    %cst = arith.constant dense<0.000000e+00> : vector<8x128xf32>
    %2 = tpu.matmul %0, %1, %cst {dimension_numbers = #tpu.dot_dimension_numbers<[1], [0], [0], [1], [0, 0, 1, 1], [], []>} : vector<8x512xf32>, vector<512x128xf32>, vector<8x128xf32> -> vector<8x128xf32>
    %c0_3 = arith.constant 0 : index
    %c0_4 = arith.constant 0 : index
    %3 = vector.load %arg3[%c0_3, %c0_4] : memref<1x128xf32, #tpu.memory_space<vmem>>, vector<1x128xf32>
    %4 = vector.broadcast %3 : vector<1x128xf32> to vector<8x128xf32>
    %5 = arith.addf %2, %4 : vector<8x128xf32>
    %cst_5 = arith.constant 0.000000e+00 : f32
    %6 = vector.broadcast %cst_5 : f32 to vector<8x128xf32>
    %7 = arith.maximumf %5, %6 : vector<8x128xf32>
    %c0_6 = arith.constant 0 : index
    %c0_7 = arith.constant 0 : index
    %8 = vector.load %arg4[%c0_6, %c0_7] : memref<1x128xf32, #tpu.memory_space<vmem>>, vector<1x128xf32>
    %9 = vector.broadcast %8 : vector<1x128xf32> to vector<8x128xf32>
    %10 = arith.mulf %7, %9 : vector<8x128xf32>
    %cst_8 = arith.constant dense<0.000000e+00> : vector<8xf32>
    %11 = vector.multi_reduction <add>, %10, %cst_8 [1] : vector<8x128xf32> to vector<8xf32>
    %12 = vector.shape_cast %11 : vector<8xf32> to vector<8x1xf32>
    %c0_9 = arith.constant 0 : index
    %c0_10 = arith.constant 0 : index
    %13 = memref.load %arg5[%c0_9, %c0_10] : memref<1x1xf32, #tpu.memory_space<smem>>
    %14 = vector.broadcast %13 : f32 to vector<8x1xf32>
    %15 = arith.addf %12, %14 : vector<8x1xf32>
    %c0_11 = arith.constant 0 : index
    %c0_12 = arith.constant 0 : index
    %16 = vector.load %arg6[%c0_11, %c0_12] : memref<8x1xf32, #tpu.memory_space<vmem>>, vector<8x1xf32>
    tpu.vector_store %arg6[%c0_11, %c0_12], %15 {strides = array<i32>} : memref<8x1xf32, #tpu.memory_space<vmem>>, vector<8x1xf32>,
    return
  }
  func.func @transform_0(%arg0: i32) -> (i32, i32) {
    %c0_i32 = arith.constant 0 : i32
    %c0_i32_0 = arith.constant 0 : i32
    return %arg0, %c0_i32 : i32, i32
  }
  func.func @transform_1(%arg0: i32) -> (i32, i32) {
    %c0_i32 = arith.constant 0 : i32
    %c0_i32_0 = arith.constant 0 : i32
    %c0_i32_1 = arith.constant 0 : i32
    return %c0_i32, %c0_i32_0 : i32, i32
  }
  func.func @transform_2(%arg0: i32) -> (i32, i32) {
    %c0_i32 = arith.constant 0 : i32
    %c0_i32_0 = arith.constant 0 : i32
    %c0_i32_1 = arith.constant 0 : i32
    return %c0_i32, %c0_i32_0 : i32, i32
  }
  func.func @transform_3(%arg0: i32) -> (i32, i32) {
    %c0_i32 = arith.constant 0 : i32
    %c0_i32_0 = arith.constant 0 : i32
    %c0_i32_1 = arith.constant 0 : i32
    return %c0_i32, %c0_i32_0 : i32, i32
  }
  func.func @transform_4(%arg0: i32) -> (i32, i32) {
    %c0_i32 = arith.constant 0 : i32
    %c0_i32_0 = arith.constant 0 : i32
    %c0_i32_1 = arith.constant 0 : i32
    return %c0_i32, %c0_i32_0 : i32, i32
  }
  func.func @transform_5(%arg0: i32) -> (i32, i32) {
    %c0_i32 = arith.constant 0 : i32
    %c0_i32_0 = arith.constant 0 : i32
    return %arg0, %c0_i32 : i32, i32
  }
}

</mosaic_0001>

<bundles_post_ra>
// kernel: profiler_h_forward.1
= control target key start
LH: loop header
LB: loop body
LE: loop exit
PB: predicated region body
PF: predicated region fallthrough
CT: control target
= control target key end

     0   :  { %11 = vsyncpa [#allocation4], 0  ;;  %s549_s0 = inlined_call_operand.hbm [shape: f32[8,512], index: 0, kind: input, shape index: {}]   ;;  %s550_s1 = inlined_call_operand.hbm [shape: f32[512,128], index: 1, kind: input, shape index: {}]   ;;  %s551_s2 = inlined_call_operand.vmem [shape: f32[1,128], index: 2, kind: input, shape index: {}]   ;;  %s552_s3 = inlined_call_operand.vmem [shape: f32[1,128], index: 3, kind: input, shape index: {}]   ;;  %s553_s4 = inlined_call_operand.<no memory space> [shape: f32[1,1], index: 4, kind: input, shape index: {}]   ;;  %s554_s5 = inlined_call_operand.vmem [shape: f32[8,1], index: 5, kind: output, shape index: {}]  }
   0x1   :  { %12 = vsyncpa [#allocation6], 0  ;;  %s472_s18 = smov [#allocation3]   ;;  %s473_s20 = smov [#allocation5]  }
   0x2   :  { %s19_s19 = sshll.u32 %s472_s18, 4  ;;  %s28_s21 = sshll.u32 %s473_s20, 4  ;;  %s20_s19 = int_to_ptr.vmem [resolvable:$true] %s19_s19  ;;  %s506_s21 = int_to_ptr.vmem [resolvable:$true] %s28_s21 }
   0x3   :  { %s424_s24 = scalar_lea.hbm %s549_s0, 512 }
   0x4   :  { %p425_p0 = scmp.ne.s32.totalorder %s549_s0, %s424_s24  ;;  %p428_p1 = scmp.lt.u32.totalorder %s424_s24, %s549_s0 }
   0x6   :  { %p430_p2 = pnand %p428_p1, %p425_p0 }
   0x8   :  { %433 = shalt.err (!%p430_p2)
}
   0x9   :  { %s434_s29 = scalar_lea.vmem %s20_s19, 512  ;;  %p439_p4 = scmp.lt.s32.totalorder %s20_s19, %s20_s19 }
   0xa   :  { %p435_p3 = scmp.ne.s32.totalorder %s20_s19, %s434_s29  ;;  %p440_p5 = scmp.lt.s32.totalorder %s434_s29, %s434_s29 }
   0xc   :  { %p441_p6 = por %p440_p5, %p439_p4 }
   0xe   :  { %p442_p7 = pnand %p441_p6, %p435_p3 }
  0x10   :  { %445 = shalt.err (!%p442_p7)
}
  0x11   :  { %22 = dma.hbm_to_vmem [thread:$0]  %s549_s0, 512, %s20_s19, [#allocation4]  }
  0x12   :  { %s446_s9 = scalar_lea.hbm %s550_s1, 8192 }
  0x13   :  { %p447_p8 = scmp.ne.s32.totalorder %s550_s1, %s446_s9  ;;  %p450_p9 = scmp.lt.u32.totalorder %s446_s9, %s550_s1 }
  0x15   :  { %p452_p10 = pnand %p450_p9, %p447_p8 }
  0x17   :  { %455 = shalt.err (!%p452_p10)
}
  0x18   :  { %s456_s14 = scalar_lea.vmem %s506_s21, 8192  ;;  %p461_p12 = scmp.lt.s32.totalorder %s506_s21, %s506_s21 }
  0x19   :  { %p457_p11 = scmp.ne.s32.totalorder %s506_s21, %s456_s14  ;;  %p462_p13 = scmp.lt.s32.totalorder %s456_s14, %s456_s14 }
  0x1b   :  { %p463_p0 = por %p462_p13, %p461_p12 }
  0x1d   :  { %p464_p1 = pnand %p463_p0, %p457_p11 }
  0x1f   :  { %467 = shalt.err (!%p464_p1)
}
  0x20   :  { %s474_s0 = smov 128   ;;  %s475_s15 = smov 8  }
  0x21   :  { %34 = dma.hbm_to_vmem [thread:$0]  %s550_s1, 8192, %s506_s21, [#allocation6], %s474_s0, %s474_s0, %s475_s15  }
  0x22   :  { %468 = dma.done.wait [#allocation4], 512  }
  0x23   :  { %469 = vsyncadd [#allocation4], 4294966784 }
  0x24   :  { %470 = dma.done.wait [#allocation6], 8192  }
  0x25   :  { %471 = vsyncadd [#allocation6], 4294959104  ;;  %v67_v0 = vld [vmem:[#allocation5 + $0x80] sm:$0xff]  ;;  %v68_v1 = vld [vmem:[#allocation5 + $0x88] sm:$0xff]  ;;  %vm276_vm0 = vcmask 7168  }
  0x26   :  { %v51_v2 = vld [vmem:[#allocation5] sm:$0xff]  ;;  %v356_v3 = vpack.c.bf16 %v68_v1, %v67_v0  ;;  %v52_v4 = vld [vmem:[#allocation5 + $0x8] sm:$0xff]  ;;  %v69_v11 = vld [vmem:[#allocation5 + $0x90] sm:$0xff] }
  0x27   :  { %v99_v5 = vld [vmem:[#allocation5 + $0x180] sm:$0xff]  ;;  %v100_v6 = vld [vmem:[#allocation5 + $0x188] sm:$0xff]  ;;  %v358_v7 = vpack.c.bf16 %v52_v4, %v51_v2  ;;  %v70_v13 = vld [vmem:[#allocation5 + $0x98] sm:$0xff] }
  0x28   :  { %v388_v8 = vpack.c.bf16 %v100_v6, %v99_v5  ;;  %v83_v9 = vld [vmem:[#allocation5 + $0x100] sm:$0xff]  ;;  %v84_v10 = vld [vmem:[#allocation5 + $0x108] sm:$0xff]  ;;  %357 = vmatprep.subr.bf16.mxu0 %v356_v3  ;;  %v53_v14 = vld [vmem:[#allocation5 + $0x10] sm:$0xff]  ;;  %v360_v16 = vpack.c.bf16 %v70_v13, %v69_v11 }
  0x29   :  { %v390_v12 = vpack.c.bf16 %v84_v10, %v83_v9  ;;  %v54_v15 = vld [vmem:[#allocation5 + $0x18] sm:$0xff]  ;;  %359 = vmatpush3.bf16.msra.mxu0 %v358_v7  ;;  %v101_v18 = vld [vmem:[#allocation5 + $0x190] sm:$0xff]  ;;  %v71_v23 = vld [vmem:[#allocation5 + $0xa0] sm:$0xff] }
  0x2a   :  { %389 = vmatprep.subr.bf16.mxu1 %v388_v8  ;;  %v362_v17 = vpack.c.bf16 %v54_v15, %v53_v14  ;;  %v102_v19 = vld [vmem:[#allocation5 + $0x198] sm:$0xff]  ;;  %v85_v20 = vld [vmem:[#allocation5 + $0x110] sm:$0xff]  ;;  %v72_v24 = vld [vmem:[#allocation5 + $0xa8] sm:$0xff]  ;;  %361 = vmatprep.subr.bf16.mxu0 %v360_v16 }
  0x2b   :  { %391 = vmatpush3.bf16.msra.mxu1 %v390_v12  ;;  %v392_v21 = vpack.c.bf16 %v102_v19, %v101_v18  ;;  %v86_v22 = vld [vmem:[#allocation5 + $0x118] sm:$0xff]  ;;  %v364_v26 = vpack.c.bf16 %v72_v24, %v71_v23  ;;  %v55_v27 = vld [vmem:[#allocation5 + $0x20] sm:$0xff]  ;;  %v56_v28 = vld [vmem:[#allocation5 + $0x28] sm:$0xff] }
  0x2c   :  { %v394_v25 = vpack.c.bf16 %v86_v22, %v85_v20  ;;  %v103_v29 = vld [vmem:[#allocation5 + $0x1a0] sm:$0xff]  ;;  %v104_v30 = vld [vmem:[#allocation5 + $0x1a8] sm:$0xff]  ;;  %v366_v33 = vpack.c.bf16 %v56_v28, %v55_v27  ;;  %v73_v35 = vld [vmem:[#allocation5 + $0xb0] sm:$0xff] }
  0x2d   :  { %393 = vmatprep.subr.bf16.mxu1 %v392_v21  ;;  %v87_v31 = vld [vmem:[#allocation5 + $0x120] sm:$0xff]  ;;  %v88_v32 = vld [vmem:[#allocation5 + $0x128] sm:$0xff]  ;;  %363 = vmatpush3.bf16.msra.mxu0 %v362_v17  ;;  %v396_v34 = vpack.c.bf16 %v104_v30, %v103_v29  ;;  %v74_v36 = vld [vmem:[#allocation5 + $0xb8] sm:$0xff] }
  0x2e   :  { %v57_v37 = vld [vmem:[#allocation5 + $0x30] sm:$0xff]  ;;  %365 = vmatprep.subr.bf16.mxu0 %v364_v26  ;;  %v398_v38 = vpack.c.bf16 %v88_v32, %v87_v31  ;;  %v368_v39 = vpack.c.bf16 %v74_v36, %v73_v35  ;;  %v58_v40 = vld [vmem:[#allocation5 + $0x38] sm:$0xff]  ;;  %v75_v46 = vld [vmem:[#allocation5 + $0xc0] sm:$0xff] }
  0x2f   :  { %395 = vmatpush3.bf16.msra.mxu1 %v394_v25  ;;  %v105_v41 = vld [vmem:[#allocation5 + $0x1b0] sm:$0xff]  ;;  %v106_v42 = vld [vmem:[#allocation5 + $0x1b8] sm:$0xff]  ;;  %v76_v47 = vld [vmem:[#allocation5 + $0xc8] sm:$0xff]  ;;  %v370_v48 = vpack.c.bf16 %v58_v40, %v57_v37 }
  0x30   :  { %397 = vmatprep.subr.bf16.mxu1 %v396_v34  ;;  %v400_v43 = vpack.c.bf16 %v106_v42, %v105_v41  ;;  %v89_v44 = vld [vmem:[#allocation5 + $0x130] sm:$0xff]  ;;  %v90_v45 = vld [vmem:[#allocation5 + $0x138] sm:$0xff]  ;;  %v107_v49 = vld [vmem:[#allocation5 + $0x1c0] sm:$0xff]  ;;  %v372_v52 = vpack.c.bf16 %v76_v47, %v75_v46 }
  0x31   :  { %367 = vmatpush3.bf16.msra.mxu0 %v366_v33  ;;  %v108_v50 = vld [vmem:[#allocation5 + $0x1c8] sm:$0xff]  ;;  %v402_v51 = vpack.c.bf16 %v90_v45, %v89_v44  ;;  %v59_v53 = vld [vmem:[#allocation5 + $0x40] sm:$0xff]  ;;  %v77_v58 = vld [vmem:[#allocation5 + $0xd0] sm:$0xff] }
  0x32   :  { %369 = vmatprep.subr.bf16.mxu0 %v368_v39  ;;  %v60_v54 = vld [vmem:[#allocation5 + $0x48] sm:$0xff]  ;;  %v91_v55 = vld [vmem:[#allocation5 + $0x140] sm:$0xff]  ;;  %v404_v56 = vpack.c.bf16 %v108_v50, %v107_v49  ;;  %v78_v59 = vld [vmem:[#allocation5 + $0xd8] sm:$0xff] }
  0x33   :  { %399 = vmatpush3.bf16.msra.mxu1 %v398_v38  ;;  %v92_v57 = vld [vmem:[#allocation5 + $0x148] sm:$0xff]  ;;  %v109_v60 = vld [vmem:[#allocation5 + $0x1d0] sm:$0xff]  ;;  %v110_v61 = vld [vmem:[#allocation5 + $0x1d8] sm:$0xff]  ;;  %v374_v62 = vpack.c.bf16 %v60_v54, %v59_v53  ;;  %v376_v0 = vpack.c.bf16 %v78_v59, %v77_v58 }
  0x34   :  { %401 = vmatprep.subr.bf16.mxu1 %v400_v43  ;;  %v406_v63 = vpack.c.bf16 %v92_v57, %v91_v55  ;;  %v61_v1 = vld [vmem:[#allocation5 + $0x50] sm:$0xff]  ;;  %v62_v2 = vld [vmem:[#allocation5 + $0x58] sm:$0xff]  ;;  %v408_v4 = vpack.c.bf16 %v110_v61, %v109_v60  ;;  %v79_v6 = vld [vmem:[#allocation5 + $0xe0] sm:$0xff] }
  0x35   :  { %371 = vmatpush3.bf16.msra.mxu0 %v370_v48  ;;  %v93_v3 = vld [vmem:[#allocation5 + $0x150] sm:$0xff]  ;;  %v94_v5 = vld [vmem:[#allocation5 + $0x158] sm:$0xff]  ;;  %v80_v7 = vld [vmem:[#allocation5 + $0xe8] sm:$0xff]  ;;  %v378_v10 = vpack.c.bf16 %v62_v2, %v61_v1  ;;  %v274_v48 = vstv %s553_s4 }
  0x36   :  { %373 = vmatprep.subr.bf16.mxu0 %v372_v52  ;;  %v111_v8 = vld [vmem:[#allocation5 + $0x1e0] sm:$0xff]  ;;  %v112_v9 = vld [vmem:[#allocation5 + $0x1e8] sm:$0xff]  ;;  %v410_v13 = vpack.c.bf16 %v94_v5, %v93_v3  ;;  %v380_v14 = vpack.c.bf16 %v80_v7, %v79_v6  ;;  %v81_v19 = vld [vmem:[#allocation5 + $0xf0] sm:$0xff] }
  0x37   :  { %403 = vmatpush3.bf16.msra.mxu1 %v402_v51  ;;  %v63_v11 = vld [vmem:[#allocation5 + $0x60] sm:$0xff]  ;;  %v64_v12 = vld [vmem:[#allocation5 + $0x68] sm:$0xff]  ;;  %v412_v18 = vpack.c.bf16 %v112_v9, %v111_v8  ;;  %v82_v20 = vld [vmem:[#allocation5 + $0xf8] sm:$0xff] }
  0x38   :  { %405 = vmatprep.subr.bf16.mxu1 %v404_v56  ;;  %v95_v15 = vld [vmem:[#allocation5 + $0x160] sm:$0xff]  ;;  %v96_v16 = vld [vmem:[#allocation5 + $0x168] sm:$0xff]  ;;  %v50_v21 = vld [vmem:[#allocation3 + $0x18] sm:$0xff]  ;;  %v382_v24 = vpack.c.bf16 %v64_v12, %v63_v11  ;;  %v384_v26 = vpack.c.bf16 %v82_v20, %v81_v19 }
  0x39   :  { %375 = vmatpush3.bf16.msra.mxu0 %v374_v62  ;;  %v48_v17 = vld [vmem:[#allocation3 + $0x8] sm:$0xff]  ;;  %v113_v22 = vld [vmem:[#allocation5 + $0x1f0] sm:$0xff]  ;;  %v114_v23 = vld [vmem:[#allocation5 + $0x1f8] sm:$0xff]  ;;  %256 = vmatprep.mubr.f32.mxu1 %v50_v21  ;;  %v414_v25 = vpack.c.bf16 %v96_v16, %v95_v15 }
  0x3a   :  { %377 = vmatprep.subr.bf16.mxu0 %v376_v0  ;;  %186 = vmatprep.mubr.f32.mxu0 %v48_v17  ;;  %v65_v27 = vld [vmem:[#allocation5 + $0x70] sm:$0xff]  ;;  %v66_v28 = vld [vmem:[#allocation5 + $0x78] sm:$0xff]  ;;  %v416_v29 = vpack.c.bf16 %v114_v23, %v113_v22  ;;  %v47_v34 = vld [vmem:[#allocation3] sm:$0xff] }
  0x3b   :  { %407 = vmatpush3.bf16.msra.mxu1 %v406_v63  ;;  %v97_v30 = vld [vmem:[#allocation5 + $0x170] sm:$0xff]  ;;  %v98_v31 = vld [vmem:[#allocation5 + $0x178] sm:$0xff]  ;;  %v386_v32 = vpack.c.bf16 %v66_v28, %v65_v27  ;;  %v284_v37 = vld [vmem:[%s551_s2] ss:$0 sm:$0xff] }
  0x3c   :  { %409 = vmatprep.subr.bf16.mxu1 %v408_v4  ;;  %v418_v33 = vpack.c.bf16 %v98_v31, %v97_v30  ;;  %v49_v35 = vld [vmem:[#allocation3 + $0x10] sm:$0xff]  ;;  %v285_v45 = vld [vmem:[%s552_s3] ss:$0 sm:$0xff] }
  0x3d   :  { %379 = vmatpush3.bf16.msra.mxu0 %v378_v10 }
  0x3e   :  { %381 = vmatprep.subr.bf16.mxu0 %v380_v14 }
  0x3f   :  { %411 = vmatpush3.bf16.msra.mxu1 %v410_v13 }
  0x40   :  { %413 = vmatprep.subr.bf16.mxu1 %v412_v18 }
  0x41   :  { %383 = vmatpush3.bf16.msra.mxu0 %v382_v24 }
  0x42   :  { %385 = vmatprep.subr.bf16.mxu0 %v384_v26 }
  0x43   :  { %415 = vmatpush3.bf16.msra.mxu1 %v414_v25 }
  0x44   :  { %417 = vmatprep.subr.bf16.mxu1 %v416_v29 }
  0x45   :  { %387 = vmatpush3.bf16.msra.mxu0 %v386_v32 }
  0x47   :  { %419 = vmatpush3.bf16.msra.mxu1 %v418_v33 }
  0x48   :  { %187 = vmatmul.mubr.f32.vlgmr.msra.gmra.mrb[0].mxu0 %v47_v34 }
  0x4a   :  { %257 = vmatmul.mubr.f32.vlgmr.msra.gmra.mrb[0].mxu1 %v49_v35 }
 0x11b   :  { %v318_v36 = vpop.f32.mrb[0].mxu0 }
 0x11c   :  { %v319_v38 = vpop.f32.mrb[1].mxu0 }
 0x11d   :  { %v353_v39 = vpop.f32.mrb[0].mxu1  ;;  %v320_v40 = vadd.f32 %v319_v38, %v318_v36 }
 0x11e   :  { %v354_v41 = vpop.f32.mrb[1].mxu1 }
 0x11f   :  { %v355_v42 = vadd.f32 %v354_v41, %v353_v39  ;;  %v189_v43 = vadd.f32 %v320_v40, %v284_v37 }
 0x121   :  { %v259_v44 = vadd.f32 %v355_v42, %v189_v43 }
 0x123   :  { %v262_v46 = vmax.f32 %v259_v44, 0.0 }
 0x125   :  { %v270_v47 = vmul.f32 %v285_v45, %v262_v46 }
 0x127   :  { %271 = vadd.xlane.f32.xlu0 %v270_v47 }
 0x1b4   :  { %v272_v49 = vpop.xlane.xlu0 %271 }
 0x1b5   :  { %v275_v50 = vadd.f32 %v274_v48, %v272_v49 }
 0x1b7   :  { %277 = vst.msk [vmem:[%s554_s5] sm:$0xff] %vm276_vm0, %v275_v50 }
 0x1b8   :  { %282 = vsyncpa [#allocation4], 1 }
 0x1b9   :  { %283 = vsyncpa [#allocation6], 1 }

</bundles_post_ra>
